<compile_context>
chip_gen: v7x
topology: tpu7x:2x2x1
jax: 0.10.0
libtpu: 0.0.40
codegen_flags: <defaults>
</compile_context>

<pallas_src>
import jax
import jax.numpy as jnp
from jax.experimental import pallas as pl
from jax.experimental.pallas import tpu as pltpu


def _dot_click_kernel(cand_ref, user_ref, out_ref):
    # cand_ref: (Bt, Ct, X)   user_ref: (Bt, X)   out_ref: (Bt, Ct)
    x = cand_ref.shape[-1]
    inv_x = jnp.float32(1.0 / x)
    cand = cand_ref[...]          # native dtype (bf16 math stays on the VPU)
    user = user_ref[...]

    if x > 128 and x % 128 == 0:
        # Accumulate 128-lane chunks with VALU adds (f32 accumulator), then a
        # single 128->1 lane reduce; keeps XLU from becoming the binding slot
        # on v7x where per-tile DMA time is short.
        acc = (cand[:, :, 0:128] * user[:, None, 0:128]).astype(jnp.float32)
        for k in range(1, x // 128):
            sl = slice(k * 128, (k + 1) * 128)
            acc = acc + (cand[:, :, sl] * user[:, None, sl]).astype(jnp.float32)
        scores = jnp.sum(acc, axis=-1)                      # (Bt, Ct), f32
    else:
        prod = cand * user[:, None, :]
        scores = jnp.sum(prod, axis=-1, dtype=jnp.float32)  # widen in the reduce

    out_ref[...] = (scores * inv_x).astype(out_ref.dtype)


def _choose_tiles(B, C, X, itemsize, block_b=None, block_c=None):
    """Pick (batch tile, candidate tile, vmem_limit_bytes)."""
    try:
        vmem_cap = int(pltpu.get_tpu_info().vmem_capacity_bytes)
    except Exception:  # pragma: no cover - be conservative (v7x per-TC VMEM)
        vmem_cap = 64 * 1024 * 1024

    sub = max(8, 32 // itemsize)              # sublane packing multiple (8 f32, 16 bf16)
    budget = vmem_cap // 2                    # whole-kernel VMEM budget (headroom kept)
    # per-copy candidate-tile target: bigger tiles amortize ~0.35us/step overhead
    target = (12 << 20) if vmem_cap >= (100 << 20) else (8 << 20)

    def per_row_bytes(ct):
        ctp = -(-ct // sub) * sub             # account for sublane padding of C
        return (2 * (ctp * X + X) * itemsize  # double-buffered candidate + user rows
                + ctp * X * 4                 # in-kernel f32 temporaries (upper bound)
                + 2 * ctp * 4)                # double-buffered output row

    def cand_row_bytes(ct):
        ctp = -(-ct // sub) * sub
        return (ctp * X + X) * itemsize

    # Candidate-dim tile: full C unless a minimal sub-row batch tile can't fit
    # VMEM; only split in lane-aligned (multiple-of-128) chunks so the output
    # block stays layout-legal.
    if block_c is not None:
        ct = max(1, min(int(block_c), C))
    else:
        ct = C
        while C >= 256 and sub * per_row_bytes(ct) > budget and ct > 128:
            ct = max(128, (ct // 2 + 127) // 128 * 128)

    if block_b is not None:
        bt = max(1, int(block_b))
    else:
        bt = max(sub, target // max(cand_row_bytes(ct), 1) // sub * sub)
        bt = min(bt, -(-B // sub) * sub)
        if B >= 4 * sub:                      # >= 4 grid steps -> 2 per v7x TensorCore
            bt = min(bt, max(sub, (B // 4) // sub * sub))
        bt = min(bt, max(sub, budget // max(per_row_bytes(ct), 1) // sub * sub))

    tile_total = per_row_bytes(ct) * bt
    vmem_limit = int(min(max(tile_total + (8 << 20), 32 << 20), (vmem_cap * 3) // 4))
    return bt, ct, vmem_limit


def dot_product_click_predictor(candidate_news_vector, user_vector, *,
                                block_b=None, block_c=None,
                                fallback_below_bytes=1 << 20):
    """candidate_news_vector: [B, C, X], user_vector: [B, X] -> [B, C]."""
    B, C, X = candidate_news_vector.shape
    assert user_vector.shape == (B, X)
    out_dtype = jnp.result_type(candidate_news_vector.dtype, user_vector.dtype)
    itemsize = jnp.dtype(candidate_news_vector.dtype).itemsize

    # Sub-tile inputs: pallas_call fixed cost dominates; let XLA fuse it.
    if candidate_news_vector.size * itemsize < fallback_below_bytes:
        return (jnp.einsum("bcx,bx->bc", candidate_news_vector, user_vector)
                / X).astype(out_dtype)

    bt, ct, vmem_limit = _choose_tiles(B, C, X, itemsize, block_b, block_c)
    n_b = max(1, -(-B // bt))
    n_c = max(1, -(-C // ct))

    grid_spec = pltpu.PrefetchScalarGridSpec(
        num_scalar_prefetch=0,
        grid=(n_b, n_c),
        in_specs=[
            pl.BlockSpec((bt, ct, X), lambda b, c: (b, c, 0)),
            pl.BlockSpec((bt, X), lambda b, c: (b, 0)),
        ],
        out_specs=pl.BlockSpec((bt, ct), lambda b, c: (b, c)),
    )

    return pl.pallas_call(
        _dot_click_kernel,
        out_shape=jax.ShapeDtypeStruct((B, C), out_dtype),
        grid_spec=grid_spec,
        compiler_params=pltpu.CompilerParams(
            dimension_semantics=("parallel", "parallel"),
            vmem_limit_bytes=vmem_limit,
        ),
        cost_estimate=pl.CostEstimate(
            flops=2 * B * C * X,
            transcendentals=0,
            bytes_accessed=itemsize * (B * C * X + B * X)
            + jnp.dtype(out_dtype).itemsize * B * C,
        ),
    )(candidate_news_vector, user_vector)


if __name__ == "__main__":
    # DotProductClickPredictor has no parameters; nothing to initialize.
    key = jax.random.PRNGKey(0)
    keys = jax.random.split(key, 10)

    def ref(cand, user):
        return (jnp.einsum("bcx,bx->bc", cand.astype(jnp.float32),
                           user.astype(jnp.float32)) / cand.shape[-1])

    # 1) f32, multi-step batch grid, X > 128 -> chunked lane-accumulate path.
    B, C, X = 16, 20, 256
    cand = jax.random.normal(keys[0], (B, C, X), dtype=jnp.float32)
    user = jax.random.normal(keys[1], (B, X), dtype=jnp.float32)
    out = jax.block_until_ready(
        dot_product_click_predictor(cand, user, block_b=8, fallback_below_bytes=0))
    assert out.shape == (B, C)
    assert jnp.allclose(out, ref(cand, user), atol=1e-5, rtol=1e-5)

    # 2) Ragged batch (B % block_b != 0) -> Pallas masks the edge block (no pad).
    B, C, X = 10, 20, 96
    cand = jax.random.normal(keys[2], (B, C, X), dtype=jnp.float32)
    user = jax.random.normal(keys[3], (B, X), dtype=jnp.float32)
    out = jax.block_until_ready(
        dot_product_click_predictor(cand, user, block_b=8, fallback_below_bytes=0))
    assert out.shape == (B, C)
    assert jnp.allclose(out, ref(cand, user), atol=1e-5, rtol=1e-5)

    # 3) Candidate-dim tiling (lane-aligned C split).
    B, C, X = 8, 256, 128
    cand = jax.random.normal(keys[4], (B, C, X), dtype=jnp.float32)
    user = jax.random.normal(keys[5], (B, X), dtype=jnp.float32)
    out = jax.block_until_ready(
        dot_product_click_predictor(cand, user, block_b=8, block_c=128,
                                    fallback_below_bytes=0))
    assert out.shape == (B, C)
    assert jnp.allclose(out, ref(cand, user), atol=1e-5, rtol=1e-5)

    # 4) bf16 inputs: native-dtype multiply on the VPU, f32 accumulation.
    B, C, X = 16, 16, 128
    cand = jax.random.normal(keys[6], (B, C, X), dtype=jnp.bfloat16)
    user = jax.random.normal(keys[7], (B, X), dtype=jnp.bfloat16)
    out = jax.block_until_ready(
        dot_product_click_predictor(cand, user, block_b=16, fallback_below_bytes=0))
    assert out.shape == (B, C)
    assert jnp.allclose(out.astype(jnp.float32), ref(cand, user), atol=2e-2, rtol=2e-2)

    # 5) Tiny input takes the fused-einsum fallback (default threshold).
    B, C, X = 2, 8, 32
    cand = jax.random.normal(keys[8], (B, C, X), dtype=jnp.float32)
    user = jax.random.normal(keys[9], (B, X), dtype=jnp.float32)
    out = jax.block_until_ready(dot_product_click_predictor(cand, user))
    assert out.shape == (B, C)
    assert jnp.allclose(out, ref(cand, user), atol=1e-5, rtol=1e-5)

    print("KERNEL_OK")
</pallas_src>

<mosaic_0001>
module attributes {stable_mosaic.version = 11 : i64} {
  func.func @_dot_click_kernel(%arg0: i32, %arg1: i32, %arg2: memref<8x20x256xf32, #tpu.memory_space<vmem>>, %arg3: memref<8x256xf32, #tpu.memory_space<vmem>>, %arg4: memref<8x20xf32, #tpu.memory_space<vmem>>) attributes {dimension_semantics = [#tpu.dimension_semantics<parallel>, #tpu.dimension_semantics<parallel>], iteration_bounds = array<i64: 2, 1>, scalar_prefetch = 0 : i64, scratch_operands = 0 : i64, tpu.core_type = #tpu.core_type<tc>, window_params = [{transform_indices = @transform_0, window_bounds = array<i64: 8, 20, 256>}, {transform_indices = @transform_1, window_bounds = array<i64: 8, 256>}, {transform_indices = @transform_2, window_bounds = array<i64: 8, 20>}]} {
    %c0 = arith.constant 0 : index
    %c0_0 = arith.constant 0 : index
    %c0_1 = arith.constant 0 : index
    %0 = vector.load %arg2[%c0, %c0_0, %c0_1] : memref<8x20x256xf32, #tpu.memory_space<vmem>>, vector<8x20x256xf32>
    %c0_2 = arith.constant 0 : index
    %c0_3 = arith.constant 0 : index
    %1 = vector.load %arg3[%c0_2, %c0_3] : memref<8x256xf32, #tpu.memory_space<vmem>>, vector<8x256xf32>
    %2 = vector.extract_strided_slice %0 {offsets = [0, 0, 0], sizes = [8, 20, 128], strides = [1, 1, 1]} : vector<8x20x256xf32> to vector<8x20x128xf32>
    %3 = vector.extract_strided_slice %1 {offsets = [0, 0], sizes = [8, 128], strides = [1, 1]} : vector<8x256xf32> to vector<8x128xf32>
    %4 = vector.shape_cast %3 : vector<8x128xf32> to vector<8x1x128xf32>
    %5 = vector.broadcast %4 : vector<8x1x128xf32> to vector<8x20x128xf32>
    %6 = arith.mulf %2, %5 : vector<8x20x128xf32>
    %7 = vector.extract_strided_slice %0 {offsets = [0, 0, 128], sizes = [8, 20, 128], strides = [1, 1, 1]} : vector<8x20x256xf32> to vector<8x20x128xf32>
    %8 = vector.extract_strided_slice %1 {offsets = [0, 128], sizes = [8, 128], strides = [1, 1]} : vector<8x256xf32> to vector<8x128xf32>
    %9 = vector.shape_cast %8 : vector<8x128xf32> to vector<8x1x128xf32>
    %10 = vector.broadcast %9 : vector<8x1x128xf32> to vector<8x20x128xf32>
    %11 = arith.mulf %7, %10 : vector<8x20x128xf32>
    %12 = arith.addf %6, %11 : vector<8x20x128xf32>
    %cst = arith.constant dense<0.000000e+00> : vector<8x20xf32>
    %13 = vector.multi_reduction <add>, %12, %cst [2] : vector<8x20x128xf32> to vector<8x20xf32>
    %cst_4 = arith.constant 3.906250e-03 : f32
    %14 = vector.broadcast %cst_4 : f32 to vector<8x20xf32>
    %15 = arith.mulf %13, %14 : vector<8x20xf32>
    %c0_5 = arith.constant 0 : index
    %c0_6 = arith.constant 0 : index
    %16 = vector.load %arg4[%c0_5, %c0_6] : memref<8x20xf32, #tpu.memory_space<vmem>>, vector<8x20xf32>
    tpu.vector_store %arg4[%c0_5, %c0_6], %15 {strides = array<i32>} : memref<8x20xf32, #tpu.memory_space<vmem>>, vector<8x20xf32>,
    return
  }
  func.func @transform_0(%arg0: i32, %arg1: i32) -> (i32, i32, i32) {
    %c0_i32 = arith.constant 0 : i32
    %c0_i32_0 = arith.constant 0 : i32
    return %arg0, %arg1, %c0_i32 : i32, i32, i32
  }
  func.func @transform_1(%arg0: i32, %arg1: i32) -> (i32, i32) {
    %c0_i32 = arith.constant 0 : i32
    %c0_i32_0 = arith.constant 0 : i32
    return %arg0, %c0_i32 : i32, i32
  }
  func.func @transform_2(%arg0: i32, %arg1: i32) -> (i32, i32) {
    %c0_i32 = arith.constant 0 : i32
    return %arg0, %arg1 : i32, i32
  }
}

</mosaic_0001>

<bundles_post_ra>
// kernel: tpu_custom_call.1
= control target key start
LH: loop header
LB: loop body
LE: loop exit
PB: predicated region body
PF: predicated region fallthrough
CT: control target
= control target key end

     0   :  { %7 = vsyncpa [#allocation3], 0  ;;  %s1315_s0 = inlined_call_operand.vmem [shape: f32[16,20,256], index: 0, kind: input, shape index: {}]   ;;  %s1316_s1 = inlined_call_operand.vmem [shape: f32[16,256], index: 1, kind: input, shape index: {}]   ;;  %s1317_s2 = inlined_call_operand.hbm [shape: f32[16,20], index: 2, kind: output, shape index: {}]  }
   0x1   :  { %9 = vsyncpa [#allocation3 + $0x1], 0  ;;  %s1017_s9 = smov 0   ;;  %s1019_s10 = smov 0  }
   0x2   :  { %s1021_s11 = smov 0   ;;  %s1023_s12 = smov 0  }
   0x3   :  { %s1025_s13 = smov 0   ;;  %s1027_s14 = smov 0  }
   0x4 LB: > { %s846_s15 = sadd.s32 4294967295, %s998_s14   ;;  %s847_s16 = sadd.s32 4294967294, %s998_s14   ;;  %s998_s14 = sphi %s1027_s14, %s15_s14   ;;  %s994_s13 = sphi %s1025_s13, %s1324_s13   ;;  %s990_s12 = sphi %s1023_s12, %s1323_s12   ;;  %s986_s11 = sphi %s1021_s11, %s1322_s11   ;;  %s982_s10 = sphi %s1019_s10, %s1321_s10   ;;  %s978_s9 = sphi %s1017_s9, %s1320_s9  }
   0x5   : > { %s27_s17 = sadd.s32 1, %s994_s13  ;;  %s90_s18 = sadd.s32 1, %s986_s11 }
   0x6   : > { %p29_p0 = scmp.ge.s32.totalorder %s27_s17, 2  ;;  %p100_p1 = scmp.ne.s32.totalorder %s986_s11, %s982_s10 }
   0x7   : > { %p101_p2 = scmp.eq.s32.totalorder %s846_s15, 1  ;;  %p106_p3 = scmp.ne.s32.totalorder %s982_s10, %s978_s9 }
   0x8   : > { %s1326_s17 = smov (%p29_p0, %s27_s17), 0  ;;  %p107_p5 = scmp.eq.s32.totalorder %s847_s16, 1 }
   0x9   : > { %p1057_p4 = por %p101_p2, %p100_p1  ;;  %s85_s20 = ssub.s32 %s994_s13, %s1326_s17 }
   0xa   : > { %p850_p6 = scmp.ge.s32.totalorder %s998_s14, 1  ;;  %p88_p7 = scmp.eq.s32.totalorder %s85_s20, 0 }
   0xb   : > { %p1064_p8 = por %p107_p5, %p106_p3  ;;  %p149_p9 = scmp.lt.s32.totalorder %s998_s14, 3 }
   0xc   : > { %s1070_s22 = scalar_select %p88_p7, %s986_s11, %s90_s18  }
   0xd   : > { %p150_p10 = pnand %p850_p6, %p149_p9 }
   0xe   : > { %s852_s23 = sshll.u32 (!%p150_p10), %s990_s12, 3  ;;  %p195_p11 = scmp.lt.s32.totalorder (!%p150_p10), %s990_s12, 1  ;;  %v255_v0 = vlaneseq (!%p150_p10)  ;;  %v1000_v1 = vmov (!%p150_p10), 1966171168   ;;  %vm506_vm0 = vcmask (!%p150_p10), 1043456   ;;  %vm618_vm1 = vcmask (!%p150_p10), 130112  }
   0xf   : > { %153 = sbr.rel (%p150_p10) target bundleno = 245 (0xf5), region = 28  ;;  %p184_p12 = scmp.lt.s32.totalorder (!%p150_p10), %s852_s23, 15  ;;  %v253_v2 = vunpack.c.l.s4 (!%p150_p10), %v1000_v1  ;;  %vm625_vm2 = vcmask (!%p150_p10), 195712   ;;  %vm725_vm3 = vcmask (!%p150_p10), 1041409   ;;  %vm727_vm4 = vcmask (!%p150_p10), 1042434  }
  0x10   : > { %v1075_v3 = vshrl.u32 (!%p150_p10), %v255_v0, 7  ;;  %v1077_v4 = vand.u32 (!%p150_p10), 127, %v255_v0  ;;  %vm729_vm5 = vcmask (!%p150_p10), 1043459   ;;  %vm731_vm6 = vcmask (!%p150_p10), 1044484   ;;  %s179_s5 = sand.u32 (!%p150_p10), 1, %s982_s10   ;;  %s857_s7 = sshll.u32 (!%p150_p10), %s990_s12, 7 }
  0x11   : > { %v254_v5 = vunpack.c.0.s8 (!%p150_p10), %v253_v2  ;;  %vm733_vm7 = vcmask (!%p150_p10), 1045509   ;;  %s851_s6 = sshll.u32 (!%p150_p10), %s179_s5, 3  ;;  %vm735_vm8 = vcmask (!%p150_p10), 1046534   ;;  %vm737_vm9 = vcmask (!%p150_p10), 1047559   ;;  %s1266_s20 = scalar_lea.hbm (!%p150_p10), %s1317_s2, %s857_s7 }
  0x12   : > { %v1081_v6 = vsub.s32 (!%p150_p10), %v1077_v4, %v1075_v3  ;;  %v1101_v11 = vsub.s32 (!%p150_p10), 0, %v1075_v3  ;;  %s181_s8 = scalar_lea.vmem (!%p150_p10), [#allocation2], %s851_s6  ;;  %vm740_vm10 = vcmask (!%p150_p10), 162816  }
  0x13   : > { %v1087_v7 = vsub.s32 (!%p150_p10), %v254_v5, %v1075_v3  ;;  %s757_s15 = sshll.u32 (!%p150_p10), %s181_s8, 4  ;;  %s1268_s15 = int_to_ptr.vmem [resolvable:$true] %s757_s15 }
  0x16   : > { %s196_s24 = scalar_select %p195_p11, %s990_s12, 1 }
  0x17   : > { %s1328_s23 = smov (!%p184_p12, %s852_s23), 15  ;;  %s743_s12 = scalar_lea.sflag [#allocation3], %s179_s5 }
  0x18   : > { %s860_s25 = sshll.u32 %s196_s24, 4  ;;  %s861_s26 = smul.u32 48, %s1328_s23 }
  0x19   : > { %s199_s29 = scalar_lea.vmem %s1316_s1, %s860_s25  ;;  %s920_s23 = scalar_lea.vmem %s1268_s15, 128 }
  0x1a   : > { %v1089_v8 = vld [vmem:[%s199_s29] sm:$0xff]  ;;  %v1091_v9 = vld [vmem:[%s199_s29 + $0x8] sm:$0xff]  ;;  %s1096_s4 = scalar_lea.vmem %s1315_s0, %s861_s26  ;;  %p921_p13 = scmp.ne.s32.totalorder %s1268_s15, %s920_s23 }
  0x1b   : > { %v258_v10 = vrot.slane %v1089_v8, %v1087_v7  ;;  %v372_v12 = vrot.slane %v1091_v9, %v1087_v7  ;;  %v200_v17 = vld [vmem:[%s1096_s4] sm:$0xff]  ;;  %v201_v18 = vld [vmem:[%s1096_s4 + $0x8] sm:$0xff]  ;;  %v202_v19 = vld [vmem:[%s1096_s4 + $0x10] sm:$0xff]  ;;  %v251_v45 = vcombine.high %v1089_v8, %v1089_v8  ;;  %v365_v50 = vcombine.high %v1091_v9, %v1091_v9  ;;  %s1001_s24 = smov [#allocation2]  }
  0x1c   : > { %v203_v24 = vld [vmem:[%s1096_s4 + $0x18] sm:$0xff]  ;;  %v204_v25 = vld [vmem:[%s1096_s4 + $0x20] sm:$0xf]  ;;  %v205_v26 = vld [vmem:[%s1096_s4 + $0x28] sm:$0xf]  ;;  %p922_p0 = pnand %p921_p13, %p1057_p4  ;;  %s924_s25 = sshll.u32 %s1001_s24, 4  ;;  %s925_s25 = int_to_ptr.vmem [resolvable:$false] %s924_s25 }
  0x1d   : > { %v274_v13 = vrot.slane %v258_v10, %v1087_v7  ;;  %v388_v14 = vrot.slane %v372_v12, %v1087_v7  ;;  %v266_v15 = vcombine.high %v258_v10, %v258_v10  ;;  %v380_v16 = vcombine.high %v372_v12, %v372_v12  ;;  %v206_v27 = vld [vmem:[%s1096_s4 + $0x30] sm:$0xff]  ;;  %v207_v28 = vld [vmem:[%s1096_s4 + $0x38] sm:$0xff]  ;;  %v208_v29 = vld [vmem:[%s1096_s4 + $0x40] sm:$0xff]  ;;  %s926_s26 = scalar_lea.vmem %s925_s25, 256  ;;  %p927_p2 = scmp.lt.s32.totalorder %s1268_s15, %s925_s25 }
  0x1e   : > { %v209_v36 = vld [vmem:[%s1096_s4 + $0x48] sm:$0xff]  ;;  %v214_v47 = vld [vmem:[%s1096_s4 + $0x70] sm:$0xff]  ;;  %v215_v48 = vld [vmem:[%s1096_s4 + $0x78] sm:$0xff]  ;;  %v265_v10 = vrot.slane %v251_v45, %v1087_v7  ;;  %v379_v12 = vrot.slane %v365_v50, %v1087_v7  ;;  %p923_p1 = pneg %p922_p0  ;;  %p928_p3 = scmp.lt.s32.totalorder %s926_s26, %s920_s23 }
  0x1f   : > { %v303_v20 = vrot.slane %v274_v13, %v1101_v11  ;;  %v417_v21 = vrot.slane %v388_v14, %v1101_v11  ;;  %v288_v22 = vrot.slane %v266_v15, %v1087_v7  ;;  %v402_v23 = vrot.slane %v380_v16, %v1087_v7  ;;  %v210_v54 = vld [vmem:[%s1096_s4 + $0x50] sm:$0xf]  ;;  %v211_v55 = vld [vmem:[%s1096_s4 + $0x58] sm:$0xf]  ;;  %v212_v57 = vld [vmem:[%s1096_s4 + $0x60] sm:$0xff] }
  0x20   : > { %v296_v30 = vcombine.high %v274_v13, %v274_v13  ;;  %v410_v31 = vcombine.high %v388_v14, %v388_v14  ;;  %v213_v58 = vld [vmem:[%s1096_s4 + $0x68] sm:$0xff]  ;;  %v216_v62 = vld [vmem:[%s1096_s4 + $0x80] sm:$0xf]  ;;  %p929_p5 = por %p928_p3, %p927_p2 }
  0x21   : > { %v340_v32 = vmul.f32 %v303_v20, %v200_v17  ;;  %v454_v33 = vmul.f32 %v417_v21, %v201_v18  ;;  %v307_v34 = vrot.slane %v288_v22, %v1101_v11  ;;  %v421_v35 = vrot.slane %v402_v23, %v1101_v11  ;;  %v217_v63 = vld [vmem:[%s1096_s4 + $0x88] sm:$0xf] }
  0x22   : > { %v341_v37 = vmul.f32 %v303_v20, %v202_v19  ;;  %v455_v38 = vmul.f32 %v417_v21, %v203_v24  ;;  %v342_v39 = vmul.f32 %v303_v20, %v204_v25  ;;  %v456_v40 = vmul.f32 %v417_v21, %v205_v26  ;;  %v218_v20 = vld [vmem:[%s1096_s4 + $0x90] sm:$0xff]  ;;  %v219_v21 = vld [vmem:[%s1096_s4 + $0x98] sm:$0xff]  ;;  %p930_p6 = pnand %p929_p5, %p923_p1 }
  0x23   : > { %v478_v41 = vadd.f32 %v454_v33, %v340_v32  ;;  %v343_v42 = vmul.f32 %v307_v34, %v206_v27  ;;  %v457_v43 = vmul.f32 %v421_v35, %v207_v28  ;;  %v344_v44 = vmul.f32 %v307_v34, %v208_v29  ;;  %v223_v24 = vld [vmem:[%s1096_s4 + $0xb8] sm:$0xf]  ;;  %v220_v28 = vld [vmem:[%s1096_s4 + $0xa0] sm:$0xff]  ;;  %v221_v29 = vld [vmem:[%s1096_s4 + $0xa8] sm:$0xff] }
  0x24   : > { %v458_v46 = vmul.f32 %v421_v35, %v209_v36  ;;  %v311_v49 = vrot.slane %v296_v30, %v1101_v11  ;;  %v479_v52 = vadd.f32 %v455_v38, %v341_v37  ;;  %v425_v53 = vrot.slane %v410_v31, %v1101_v11 }
  0x25   : > { %502 = vadd.xlane.f32.xlu0 %v478_v41  ;;  %v481_v51 = vadd.f32 %v457_v43, %v343_v42  ;;  %v480_v56 = vadd.f32 %v456_v40, %v342_v39  ;;  %v345_v0 = vmul.f32 %v307_v34, %v210_v54  ;;  %v459_v1 = vmul.f32 %v421_v35, %v211_v55  ;;  %v224_v42 = vld [vmem:[%s1096_s4 + $0xc0] sm:$0xff]  ;;  %v225_v43 = vld [vmem:[%s1096_s4 + $0xc8] sm:$0xff] }
  0x26   : > { %v482_v59 = vadd.f32 %v458_v46, %v344_v44  ;;  %v347_v60 = vmul.f32 %v311_v49, %v214_v47  ;;  %v461_v61 = vmul.f32 %v425_v53, %v215_v48  ;;  %v298_v2 = vcombine.high %v288_v22, %v288_v22  ;;  %v226_v44 = vld [vmem:[%s1096_s4 + $0xd0] sm:$0xff]  ;;  %v227_v46 = vld [vmem:[%s1096_s4 + $0xd8] sm:$0xff]  ;;  %v228_v47 = vld [vmem:[%s1096_s4 + $0xe0] sm:$0xf] }
  0x27   : > { %510 = vadd.xlane.f32.xlu1 %v481_v51  ;;  %v412_v5 = vcombine.high %v402_v23, %v402_v23  ;;  %v346_v8 = vmul.f32 %v311_v49, %v212_v57  ;;  %v460_v9 = vmul.f32 %v425_v53, %v213_v58  ;;  %v507_v13 = vsel %vm506_vm0, %v480_v56, 0.0  ;;  %v222_v23 = vld [vmem:[%s1096_s4 + $0xb0] sm:$0xf]  ;;  %v229_v48 = vld [vmem:[%s1096_s4 + $0xe8] sm:$0xf] }
  0x28   : > { %v348_v14 = vmul.f32 %v311_v49, %v216_v62  ;;  %v462_v15 = vmul.f32 %v425_v53, %v217_v63  ;;  %v485_v16 = vadd.f32 %v461_v61, %v347_v60  ;;  %v315_v17 = vrot.slane %v298_v2, %v1101_v11  ;;  %v230_v61 = vld [vmem:[%s1096_s4 + $0xf0] sm:$0xff]  ;;  %v231_v62 = vld [vmem:[%s1096_s4 + $0xf8] sm:$0xff] }
  0x29   : > { %504 = vadd.xlane.f32.xlu0 %v479_v52  ;;  %v429_v18 = vrot.slane %v412_v5, %v1101_v11  ;;  %v483_v19 = vadd.f32 %v459_v1, %v345_v0  ;;  %v484_v22 = vadd.f32 %v460_v9, %v346_v8  ;;  %v1147_v25 = vrot.slane %v265_v10, %v1087_v7  ;;  %v234_v1 = vld [vmem:[%s1096_s4 + $0x110] sm:$0xf]  ;;  %v235_v2 = vld [vmem:[%s1096_s4 + $0x118] sm:$0xf] }
  0x2a   : > { %v1150_v26 = vrot.slane %v379_v12, %v1087_v7  ;;  %v486_v27 = vadd.f32 %v462_v15, %v348_v14  ;;  %v349_v30 = vmul.f32 %v315_v17, %v218_v20  ;;  %v267_v32 = vcombine.high %v265_v10, %v265_v10 }
  0x2b   : > { %512 = vadd.xlane.f32.xlu1 %v482_v59  ;;  %v463_v31 = vmul.f32 %v429_v18, %v219_v21  ;;  %v381_v33 = vcombine.high %v379_v12, %v379_v12  ;;  %v514_v34 = vsel %vm506_vm0, %v483_v19, 0.0  ;;  %v351_v35 = vmul.f32 %v315_v17, %v222_v23  ;;  %v232_v12 = vld [vmem:[%s1096_s4 + $0x100] sm:$0xff] }
  0x2c   : > { %v465_v36 = vmul.f32 %v429_v18, %v223_v24  ;;  %v350_v37 = vmul.f32 %v315_v17, %v220_v28  ;;  %v464_v38 = vmul.f32 %v429_v18, %v221_v29  ;;  %v319_v39 = vrot.slane %v1147_v25, %v1101_v11  ;;  %v240_v28 = vld [vmem:[%s1096_s4 + $0x140] sm:$0xf]  ;;  %v241_v29 = vld [vmem:[%s1096_s4 + $0x148] sm:$0xf] }
  0x2d   : > { %508 = vadd.xlane.f32.xlu0 %v507_v13  ;;  %v433_v40 = vrot.slane %v1150_v26, %v1101_v11  ;;  %v521_v41 = vsel %vm506_vm0, %v486_v27, 0.0  ;;  %v487_v45 = vadd.f32 %v463_v31, %v349_v30  ;;  %v1167_v49 = vrot.slane %v267_v32, %v1087_v7  ;;  %v233_v13 = vld [vmem:[%s1096_s4 + $0x108] sm:$0xff] }
  0x2e   : > { %v1170_v50 = vrot.slane %v381_v33, %v1087_v7  ;;  %v489_v51 = vadd.f32 %v465_v36, %v351_v35  ;;  %v488_v52 = vadd.f32 %v464_v38, %v350_v37  ;;  %v352_v53 = vmul.f32 %v319_v39, %v224_v42  ;;  %v237_v27 = vld [vmem:[%s1096_s4 + $0x128] sm:$0xff]  ;;  %v238_v33 = vld [vmem:[%s1096_s4 + $0x130] sm:$0xff] }
  0x2f   : > { %519 = vadd.xlane.f32.xlu1 %v485_v16  ;;  %v466_v54 = vmul.f32 %v433_v40, %v225_v43  ;;  %v353_v55 = vmul.f32 %v319_v39, %v226_v44  ;;  %v467_v56 = vmul.f32 %v433_v40, %v227_v46  ;;  %v354_v57 = vmul.f32 %v319_v39, %v228_v47  ;;  %v242_v44 = vld [vmem:[%s1096_s4 + $0x150] sm:$0xff] }
  0x30   : > { %v468_v58 = vmul.f32 %v433_v40, %v229_v48  ;;  %v323_v59 = vrot.slane %v1167_v49, %v1101_v11  ;;  %v437_v7 = vrot.slane %v1170_v50, %v1101_v11  ;;  %v528_v60 = vsel %vm506_vm0, %v489_v51, 0.0  ;;  %v246_v47 = vld [vmem:[%s1096_s4 + $0x170] sm:$0xf]  ;;  %v247_v48 = vld [vmem:[%s1096_s4 + $0x178] sm:$0xf]  ;;  %v245_v51 = vld [vmem:[%s1096_s4 + $0x168] sm:$0xff] }
  0x31   : > { %517 = vadd.xlane.f32.xlu0 %v484_v22  ;;  %v297_v63 = vcombine.high %v1147_v25, %v1147_v25  ;;  %v490_v0 = vadd.f32 %v466_v54, %v352_v53  ;;  %v411_v5 = vcombine.high %v1150_v26, %v1150_v26  ;;  %v613_v8 = vadd.s32 4294967288, %v1077_v4  ;;  %v236_v26 = vld [vmem:[%s1096_s4 + $0x120] sm:$0xff] }
  0x32   : > { %v491_v9 = vadd.f32 %v467_v56, %v353_v55  ;;  %v492_v10 = vadd.f32 %v468_v58, %v354_v57  ;;  %v355_v14 = vmul.f32 %v323_v59, %v230_v61  ;;  %v469_v15 = vmul.f32 %v437_v7, %v231_v62 }
  0x33   : > { %515 = vadd.xlane.f32.xlu1 %v514_v34  ;;  %v1189_v16 = vsub.s32 %v613_v8, %v1075_v3  ;;  %v620_v17 = vadd.s32 4294967280, %v1077_v4  ;;  %v357_v18 = vmul.f32 %v323_v59, %v234_v1  ;;  %v471_v19 = vmul.f32 %v437_v7, %v235_v2 }
  0x34   : > { %v327_v20 = vrot.slane %v297_v63, %v1101_v11  ;;  %v356_v21 = vmul.f32 %v323_v59, %v232_v12  ;;  %v470_v22 = vmul.f32 %v437_v7, %v233_v13  ;;  %v441_v23 = vrot.slane %v411_v5, %v1101_v11 }
  0x35   : > { %522 = vadd.xlane.f32.xlu0 %v521_v41  ;;  %v1195_v24 = vsub.s32 %v620_v17, %v1075_v3  ;;  %v535_v25 = vsel %vm506_vm0, %v492_v10, 0.0  ;;  %v493_v4 = vadd.f32 %v469_v15, %v355_v14  ;;  %v299_v30 = vcombine.high %v1167_v49, %v1167_v49  ;;  %v239_v3 = vld [vmem:[%s1096_s4 + $0x138] sm:$0xff] }
  0x36   : > { %v413_v31 = vcombine.high %v1170_v50, %v1170_v50  ;;  %v495_v32 = vadd.f32 %v471_v19, %v357_v18  ;;  %v494_v34 = vadd.f32 %v470_v22, %v356_v21  ;;  %v358_v35 = vmul.f32 %v327_v20, %v236_v26  ;;  %v244_v50 = vld [vmem:[%s1096_s4 + $0x160] sm:$0xff] }
  0x37   : > { %524 = vadd.xlane.f32.xlu1 %v487_v45  ;;  %v472_v36 = vmul.f32 %v441_v23, %v237_v27  ;;  %v360_v37 = vmul.f32 %v327_v20, %v240_v28  ;;  %v474_v38 = vmul.f32 %v441_v23, %v241_v29  ;;  %v359_v39 = vmul.f32 %v327_v20, %v238_v33  ;;  %v243_v45 = vld [vmem:[%s1096_s4 + $0x158] sm:$0xff] }
  0x38   : > { %v473_v40 = vmul.f32 %v441_v23, %v239_v3  ;;  %v331_v41 = vrot.slane %v299_v30, %v1101_v11  ;;  %v445_v42 = vrot.slane %v413_v31, %v1101_v11  ;;  %v542_v43 = vsel %vm506_vm0, %v495_v32, 0.0 }
  0x39   : > { %526 = vadd.xlane.f32.xlu0 %v488_v52  ;;  %v496_v46 = vadd.f32 %v472_v36, %v358_v35  ;;  %v498_v49 = vadd.f32 %v474_v38, %v360_v37 }
  0x3a   : > { %v497_v52 = vadd.f32 %v473_v40, %v359_v39  ;;  %v361_v53 = vmul.f32 %v331_v41, %v242_v44  ;;  %v475_v54 = vmul.f32 %v445_v42, %v243_v45  ;;  %v363_v55 = vmul.f32 %v331_v41, %v246_v47 }
  0x3b   : > { %529 = vadd.xlane.f32.xlu1 %v528_v60  ;;  %v477_v56 = vmul.f32 %v445_v42, %v247_v48  ;;  %v362_v57 = vmul.f32 %v331_v41, %v244_v50  ;;  %v476_v11 = vmul.f32 %v445_v42, %v245_v51  ;;  %v549_v58 = vsel %vm506_vm0, %v498_v49, 0.0 }
  0x3c   : > { %v499_v59 = vadd.f32 %v475_v54, %v361_v53 }
  0x3d   : > { %531 = vadd.xlane.f32.xlu0 %v490_v0  ;;  %v501_v7 = vadd.f32 %v477_v56, %v363_v55  ;;  %v500_v60 = vadd.f32 %v476_v11, %v362_v57 }
  0x3f   : > { %533 = vadd.xlane.f32.xlu1 %v491_v9  ;;  %v556_v61 = vsel %vm506_vm0, %v501_v7, 0.0 }
  0x41   : > { %536 = vadd.xlane.f32.xlu0 %v535_v25 }
  0x43   : > { %538 = vadd.xlane.f32.xlu1 %v493_v4 }
  0x45   : > { %540 = vadd.xlane.f32.xlu0 %v494_v34 }
  0x47   : > { %543 = vadd.xlane.f32.xlu1 %v542_v43 }
  0x49   : > { %545 = vadd.xlane.f32.xlu0 %v496_v46 }
  0x4b   : > { %547 = vadd.xlane.f32.xlu1 %v497_v52 }
  0x4d   : > { %550 = vadd.xlane.f32.xlu0 %v549_v58 }
  0x4f   : > { %552 = vadd.xlane.f32.xlu1 %v499_v59 }
  0x51   : > { %554 = vadd.xlane.f32.xlu0 %v500_v60 }
  0x53   : > { %557 = vadd.xlane.f32.xlu1 %v556_v61 }
  0xb2   : > { %v503_v62 = vpop.xlane.xlu0 %502 }
  0xb3   : > { %v559_v0 = vmul.f32 0.00390625, %v503_v62 }
  0xb4   : > { %v511_v63 = vpop.xlane.xlu1 %510 }
  0xb5   : > { %v562_v2 = vmul.f32 0.00390625, %v511_v63  ;;  %v612_v9 = vrot.slane %v559_v0, %v1081_v6 }
  0xb6   : > { %v505_v1 = vpop.xlane.xlu0 %504 }
  0xb7   : > { %v560_v5 = vmul.f32 0.00390625, %v505_v1  ;;  %v630_v14 = vrot.slane %v562_v2, %v1081_v6 }
  0xb8   : > { %v513_v8 = vpop.xlane.xlu1 %512 }
  0xb9   : > { %v617_v10 = vrot.slane %v560_v5, %v1189_v16  ;;  %v563_v12 = vmul.f32 0.00390625, %v513_v8 }
  0xba   : > { %v509_v13 = vpop.xlane.xlu0 %508 }
  0xbb   : > { %v619_v15 = vsel %vm618_vm1, %v617_v10, %v612_v9  ;;  %v634_v17 = vrot.slane %v563_v12, %v1189_v16  ;;  %v561_v18 = vmul.f32 0.00390625, %v509_v13 }
  0xbc   : > { %v520_v19 = vpop.xlane.xlu1 %519 }
  0xbd   : > { %v635_v20 = vsel %vm618_vm1, %v634_v17, %v630_v14  ;;  %v624_v21 = vrot.slane %v561_v18, %v1195_v24  ;;  %v566_v22 = vmul.f32 0.00390625, %v520_v19 }
  0xbe   : > { %v518_v23 = vpop.xlane.xlu0 %517 }
  0xbf   : > { %v626_v25 = vsel %vm625_vm2, %v624_v21, %v619_v15  ;;  %v565_v26 = vmul.f32 0.00390625, %v518_v23  ;;  %v648_v4 = vrot.slane %v566_v22, %v1189_v16 }
  0xc0   : > { %v516_v27 = vpop.xlane.xlu1 %515 }
  0xc1   : > { %v644_v28 = vrot.slane %v565_v26, %v1081_v6  ;;  %v564_v29 = vmul.f32 0.00390625, %v516_v27 }
  0xc2   : > { %v523_v30 = vpop.xlane.xlu0 %522 }
  0xc3   : > { %v649_v31 = vsel %vm618_vm1, %v648_v4, %v644_v28  ;;  %v639_v32 = vrot.slane %v564_v29, %v1195_v24  ;;  %v567_v33 = vmul.f32 0.00390625, %v523_v30 }
  0xc4   : > { %v525_v3 = vpop.xlane.xlu1 %524 }
  0xc5   : > { %v640_v34 = vsel %vm625_vm2, %v639_v32, %v635_v20  ;;  %v653_v35 = vrot.slane %v567_v33, %v1195_v24  ;;  %v568_v36 = vmul.f32 0.00390625, %v525_v3 }
  0xc6   : > { %v726_v37 = vsel %vm725_vm3, %v640_v34, %v626_v25  ;;  %v527_v38 = vpop.xlane.xlu0 %526 }
  0xc7   : > { %v654_v39 = vsel %vm625_vm2, %v653_v35, %v649_v31  ;;  %v569_v40 = vmul.f32 0.00390625, %v527_v38  ;;  %v658_v43 = vrot.slane %v568_v36, %v1081_v6 }
  0xc8   : > { %v728_v41 = vsel %vm727_vm4, %v654_v39, %v726_v37  ;;  %v530_v42 = vpop.xlane.xlu1 %529 }
  0xc9   : > { %v662_v44 = vrot.slane %v569_v40, %v1189_v16  ;;  %v570_v45 = vmul.f32 0.00390625, %v530_v42 }
  0xca   : > { %v532_v46 = vpop.xlane.xlu0 %531 }
  0xcb   : > { %v663_v47 = vsel %vm618_vm1, %v662_v44, %v658_v43  ;;  %v667_v48 = vrot.slane %v570_v45, %v1195_v24  ;;  %v571_v49 = vmul.f32 0.00390625, %v532_v46 }
  0xcc   : > { %v534_v50 = vpop.xlane.xlu1 %533 }
  0xcd   : > { %v668_v51 = vsel %vm625_vm2, %v667_v48, %v663_v47  ;;  %v672_v52 = vrot.slane %v571_v49, %v1081_v6  ;;  %v572_v53 = vmul.f32 0.00390625, %v534_v50 }
  0xce   : > { %v730_v54 = vsel %vm729_vm5, %v668_v51, %v728_v41  ;;  %v537_v55 = vpop.xlane.xlu0 %536 }
  0xcf   : > { %v676_v56 = vrot.slane %v572_v53, %v1189_v16  ;;  %v573_v57 = vmul.f32 0.00390625, %v537_v55 }
  0xd0   : > { %v539_v11 = vpop.xlane.xlu1 %538 }
  0xd1   : > { %v677_v58 = vsel %vm618_vm1, %v676_v56, %v672_v52  ;;  %v681_v59 = vrot.slane %v573_v57, %v1195_v24  ;;  %v574_v7 = vmul.f32 0.00390625, %v539_v11 }
  0xd2   : > { %v541_v60 = vpop.xlane.xlu0 %540 }
  0xd3   : > { %v682_v61 = vsel %vm625_vm2, %v681_v59, %v677_v58  ;;  %v575_v62 = vmul.f32 0.00390625, %v541_v60  ;;  %v686_v1 = vrot.slane %v574_v7, %v1081_v6 }
  0xd4   : > { %v732_v63 = vsel %vm731_vm6, %v682_v61, %v730_v54  ;;  %v544_v0 = vpop.xlane.xlu1 %543 }
  0xd5   : > { %v690_v2 = vrot.slane %v575_v62, %v1189_v16  ;;  %v576_v5 = vmul.f32 0.00390625, %v544_v0 }
  0xd6   : > { %v546_v8 = vpop.xlane.xlu0 %545 }
  0xd7   : > { %v691_v9 = vsel %vm618_vm1, %v690_v2, %v686_v1  ;;  %v695_v10 = vrot.slane %v576_v5, %v1195_v24  ;;  %v577_v12 = vmul.f32 0.00390625, %v546_v8 }
  0xd8   : > { %v548_v13 = vpop.xlane.xlu1 %547 }
  0xd9   : > { %v696_v14 = vsel %vm625_vm2, %v695_v10, %v691_v9  ;;  %v700_v15 = vrot.slane %v577_v12, %v1081_v6  ;;  %v578_v17 = vmul.f32 0.00390625, %v548_v13 }
  0xda   : > { %v734_v18 = vsel %vm733_vm7, %v696_v14, %v732_v63  ;;  %v551_v19 = vpop.xlane.xlu0 %550 }
  0xdb   : > { %v704_v20 = vrot.slane %v578_v17, %v1189_v16  ;;  %v579_v21 = vmul.f32 0.00390625, %v551_v19 }
  0xdc   : > { %v553_v22 = vpop.xlane.xlu1 %552 }
  0xdd   : > { %v705_v23 = vsel %vm618_vm1, %v704_v20, %v700_v15  ;;  %v709_v25 = vrot.slane %v579_v21, %v1195_v24  ;;  %v580_v26 = vmul.f32 0.00390625, %v553_v22 }
  0xde   : > { %v555_v27 = vpop.xlane.xlu0 %554 }
  0xdf   : > { %v710_v4 = vsel %vm625_vm2, %v709_v25, %v705_v23  ;;  %v581_v28 = vmul.f32 0.00390625, %v555_v27  ;;  %v714_v31 = vrot.slane %v580_v26, %v1081_v6 }
  0xe0   : > { %v558_v29 = vpop.xlane.xlu1 %557  ;;  %v736_v30 = vsel %vm735_vm8, %v710_v4, %v734_v18 }
  0xe1   : > { %v718_v32 = vrot.slane %v581_v28, %v1189_v16  ;;  %v582_v33 = vmul.f32 0.00390625, %v558_v29 }
  0xe3   : > { %v719_v3 = vsel %vm618_vm1, %v718_v32, %v714_v31  ;;  %v723_v34 = vrot.slane %v582_v33, %v1195_v24 }
  0xe5   : > { %v724_v35 = vsel %vm625_vm2, %v723_v34, %v719_v3 }
  0xe6   : > { %v738_v6 = vsel %vm737_vm9, %v724_v35, %v736_v30 }
  0xe7   : > { %741 = vst.msk [vmem:[%s181_s8] sm:$0xff] %vm740_vm10, %v738_v6 }
  0xe8   : > { %933 = shalt.err (!%p930_p6)
}
  0xe9   : > { %s934_s27 = scalar_lea.hbm %s1266_s20, 128  ;;  %s938_s30 = scalar_lea.hbm %s1317_s2, 256 }
  0xea   : > { %p935_p7 = scmp.ne.s32.totalorder %s1266_s20, %s934_s27  ;;  %p939_p11 = scmp.lt.u32.totalorder %s1266_s20, %s1317_s2 }
  0xeb   : > { %p940_p12 = scmp.lt.u32.totalorder %s938_s30, %s934_s27  ;;  %p942_p0 = scmp.lt.u32.totalorder %s934_s27, %s1266_s20 }
  0xec   : > { %p936_p9 = pnand %p935_p7, %p1057_p4 }
  0xed   : > { %p941_p13 = por %p940_p12, %p939_p11 }
  0xee   : > { %p937_p10 = pneg %p936_p9 }
  0xef   : > { %p943_p1 = por %p942_p0, %p941_p13 }
  0xf1   : > { %p944_p2 = pnand %p943_p1, %p937_p10 }
  0xf3   : > { %947 = shalt.err (!%p944_p2)
}
  0xf4   : > { %862 = dma.vmem_to_hbm [thread:$0]  (%p1057_p4), %s1268_s15, 128, %s1266_s20, %s743_s12  }
  0xf5 PF: > { %p868_p3 = scmp.ge.s32.totalorder %s998_s14, 2  ;;  %s769_s5 = sand.u32 1, %s978_s9  }
  0xf6   : > { %s770_s6 = scalar_lea.sflag [#allocation3], %s769_s5 }
  0xf7   : > { %p865_p5 = pnand %p868_p3, %p1064_p8 }
  0xf9   : > { %973 = dma.done.wait (!%p865_p5), %s770_s6, 128  }
  0xfa   : > { %975 = vsyncadd (!%p865_p5), %s770_s6, 4294967168  ;;  %s15_s14 = sadd.s32 1, %s998_s14   ;;  %s1320_s9 = smov %s982_s10 }
  0xfb   : > { %p12_p6 = scmp.ge.s32.totalorder %s15_s14, 4   ;;  %s1321_s10 = smov %s986_s11 }
  0xfc   : > { %s1322_s11 = smov %s1070_s22  ;;  %s1323_s12 = smov %s994_s13 }
  0xfd   : > { %s1324_s13 = smov %s1326_s17  ;;  %14 = sbr.rel (!%p12_p6) target bundleno = 4 (0x4), region = 66 }
 0x104   :  { %775 = vsyncpa [#allocation3], 1 }
 0x105   :  { %777 = vsyncpa [#allocation3 + $0x1], 1 }

</bundles_post_ra>
